<compile_context>
chip_gen: v7x
topology: tpu7x:2x2x1
jax: 0.10.0
libtpu: 0.0.40
codegen_flags: <defaults>
</compile_context>

<pallas_src>
import functools

import jax
import jax.numpy as jnp
from jax import lax
from jax.experimental import pallas as pl
from jax.experimental.pallas import tpu as pltpu


# ----------------------------------------------------------------------------
# Hardware helpers
# ----------------------------------------------------------------------------
def _vmem_capacity_bytes():
    try:
        return int(pltpu.get_tpu_info().vmem_capacity_bytes)
    except Exception:
        return 64 << 20  # conservative (v7x-sized) fallback


@functools.lru_cache(maxsize=1)
def _roll_shift_sign():
    """Returns s so that pltpu.roll(x, (s*d) % n, axis=1)[:, i] == x[:, i + d].

    Tiny probe kernel that pins down the rotation direction so the depthwise
    taps are immune to any convention drift across jaxlib versions.
    """
    def probe(x_ref, o_ref):
        o_ref[...] = pltpu.roll(x_ref[...], 1, axis=1)

    x = jnp.tile(jnp.arange(128, dtype=jnp.int32)[None, :], (8, 1))
    y = pl.pallas_call(
        probe, out_shape=jax.ShapeDtypeStruct((8, 128), jnp.int32))(x)
    # jnp.roll-style (out[i] = x[i - shift]):  y[0, 1] == x[0, 0] == 0
    return -1 if int(y[0, 1]) == 0 else 1


def _valid_tile_rows(H, W):
    rs = []
    for r in range(1, H + 1):
        if H % r == 0 and ((r * W) % 128 == 0 or r == H):
            rs.append(r)
    return rs


def _pick_tile_rows(H, W, C, budget_bytes):
    rs = _valid_tile_rows(H, W)

    def est(r):  # conservative per-step VMEM estimate (fp32 qkv slabs dominate)
        return 32 * C * (r + 2) * W * 4

    fitting = [r for r in rs if est(r) <= budget_bytes]
    return max(fitting) if fitting else min(rs)


# ----------------------------------------------------------------------------
# Pass 1: qkv 1x1 conv + depthwise 3x3 per spatial tile, accumulate attention
#         statistics, emit v tiles and the finalized (C,C) attention matrix.
# ----------------------------------------------------------------------------
def _qkv_stats_kernel(temp_ref, x_ref, xu_ref, xd_ref, wq_ref, bq_ref,
                      wd_ref, bd_ref, v_ref, attn_ref, s_ref, nq_ref, nk_ref,
                      *, num_heads, H, W, R, roll_sign):
    C = x_ref.shape[0]
    ch = C // num_heads
    RW = R * W
    EW = (R + 2) * W
    t = pl.program_id(1)

    # ---- extended tile (1-row halo top+bottom); qkv 1x1 conv on the MXU ----
    x_ext = jnp.concatenate([xu_ref[...], x_ref[...], xd_ref[...]], axis=1)
    qkv = jnp.dot(wq_ref[...], x_ext, preferred_element_type=jnp.float32)
    qkv = qkv + bq_ref[...]                                    # (3C, EW) f32

    # Zero halo rows that fall outside the image (== dwconv zero padding).
    pos = lax.broadcasted_iota(jnp.int32, (1, EW), 1)
    grow = t * R - 1 + pos // W
    col = pos % W
    qkv = jnp.where((grow >= 0) & (grow < H), qkv, 0.0)

    # ---- depthwise 3x3: 2 masked lane rolls for dx, reused across dy taps ----
    shifted = {}
    for dx in (-1, 0, 1):
        if dx == 0:
            shifted[dx] = qkv
        else:
            rolled = pltpu.roll(qkv, (roll_sign * dx) % EW, axis=1)
            ok = (col >= 1) if dx == -1 else (col <= W - 2)
            shifted[dx] = jnp.where(ok, rolled, 0.0)

    wd = wd_ref[...]                                           # (3C, 9) f32
    acc = shifted[0] * wd[:, 4:5]                              # center tap
    for dy in (-1, 0, 1):
        for dx in (-1, 0, 1):
            if dy == 0 and dx == 0:
                continue
            src = shifted[dx]
            if dy != 0:
                src = pltpu.roll(src, (roll_sign * dy * W) % EW, axis=1)
            kk = (dy + 1) * 3 + (dx + 1)
            acc = acc + src * wd[:, kk:kk + 1]
    qkv_dw = acc[:, W:W + RW] + bd_ref[...]                    # (3C, RW) f32

    q = qkv_dw[0:C]
    k = qkv_dw[C:2 * C]
    v = qkv_dw[2 * C:3 * C]

    @pl.when(t == 0)
    def _():
        s_ref[...] = jnp.zeros_like(s_ref)
        nq_ref[...] = jnp.zeros_like(nq_ref)
        nk_ref[...] = jnp.zeros_like(nk_ref)

    # fp32 norms, bf16 MXU inputs with fp32 accumulation for the logits.
    nq_ref[...] += jnp.sum(q * q, axis=-1, keepdims=True)
    nk_ref[...] += jnp.sum(k * k, axis=-1, keepdims=True)
    s_ref[...] += lax.dot_general(
        q.astype(jnp.bfloat16), k.astype(jnp.bfloat16),
        (((1,), (1,)), ((), ())), preferred_element_type=jnp.float32)
    v_ref[...] = v.astype(v_ref.dtype)

    @pl.when(t == pl.num_programs(1) - 1)
    def _():
        eps2 = 1e-24   # (torch.nn.functional.normalize eps = 1e-12) ** 2
        inv_q = lax.rsqrt(jnp.maximum(nq_ref[...], eps2))      # (C, 1)
        inv_k = lax.rsqrt(jnp.maximum(nk_ref[...], eps2))      # (C, 1)
        ii = lax.broadcasted_iota(jnp.int32, (C, C), 0)
        jj = lax.broadcasted_iota(jnp.int32, (C, C), 1)
        dk = jnp.where(ii == jj, inv_k, 0.0)                   # diag(1/||k_j||)
        logits = jnp.dot(s_ref[...] * inv_q, dk,
                         preferred_element_type=jnp.float32)   # (C, C)
        logits = logits * temp_ref[...]                        # per-row temp
        # Block-masked single softmax replaces the per-head loop.
        logits = jnp.where((ii // ch) == (jj // ch), logits, -1e30)
        logits = logits - jnp.max(logits, axis=-1, keepdims=True)
        p = jnp.exp(logits)
        attn = p / jnp.sum(p, axis=-1, keepdims=True)
        attn_ref[...] = attn.astype(attn_ref.dtype)


# ----------------------------------------------------------------------------
# Pass 2: attn @ v  +  project_out 1x1 conv, fully parallel over (batch, tile)
# ----------------------------------------------------------------------------
def _attn_out_kernel(attn_ref, v_ref, wp_ref, bp_ref, y_ref):
    o = jnp.dot(attn_ref[...], v_ref[...],
                preferred_element_type=jnp.float32)            # (C, RW)
    y = jnp.dot(wp_ref[...], o.astype(jnp.bfloat16),
                preferred_element_type=jnp.float32) + bp_ref[...]
    y_ref[...] = y.astype(y_ref.dtype)


# ----------------------------------------------------------------------------
# Forward wrapper (matches Attention.forward semantics)
# ----------------------------------------------------------------------------
@functools.partial(
    jax.jit,
    static_argnames=("num_heads", "tile_rows", "roll_sign", "vmem_cap"))
def _attention_impl(x, params, *, num_heads, tile_rows, roll_sign, vmem_cap):
    B, C, H, W = x.shape
    HW = H * W
    C3 = 3 * C
    R = tile_rows
    T = H // R
    RW = R * W

    bf16 = jnp.bfloat16
    x_bf = x.astype(bf16)
    x3 = x_bf.reshape(B, C, HW)      # lane-dense (C, H*W) activations
    x4 = x_bf                        # (B, C, H, W) view for the halo rows

    qkv_w = params["qkv_w"].astype(bf16)                       # (3C, C)
    qkv_b = params["qkv_b"].reshape(C3, 1).astype(jnp.float32)
    dw_w = params["dw_w"].reshape(C3, 9).astype(jnp.float32)   # taps on lanes
    dw_b = params["dw_b"].reshape(C3, 1).astype(jnp.float32)
    proj_w = params["proj_w"].astype(bf16)                     # (C, C)
    proj_b = params["proj_b"].reshape(C, 1).astype(jnp.float32)
    ch = C // num_heads
    temp_rows = jnp.repeat(
        params["temperature"].reshape(num_heads).astype(jnp.float32),
        ch).reshape(C, 1)

    cap = max(32 << 20, min(vmem_cap - (16 << 20), 100 << 20))
    est = 32 * C * (R + 2) * W * 4
    lim_a = int(min(cap, max(2 * est + (8 << 20), 32 << 20)))
    lim_b = int(min(cap, 32 << 20))

    kern_a = functools.partial(_qkv_stats_kernel, num_heads=num_heads,
                               H=H, W=W, R=R, roll_sign=roll_sign)

    v_hbm, attn = pl.pallas_call(
        kern_a,
        out_shape=(jax.ShapeDtypeStruct((B, C, HW), bf16),
                   jax.ShapeDtypeStruct((B, C, C), bf16)),
        grid=(B, T),
        in_specs=[
            pl.BlockSpec((C, 1), lambda b, t: (0, 0)),                 # temp
            pl.BlockSpec((None, C, RW), lambda b, t: (b, 0, t)),       # x tile
            pl.BlockSpec((None, C, None, W),                           # halo up
                         lambda b, t: (b, 0, jnp.maximum(t * R - 1, 0), 0)),
            pl.BlockSpec((None, C, None, W),                           # halo dn
                         lambda b, t: (b, 0, jnp.minimum((t + 1) * R, H - 1), 0)),
            pl.BlockSpec((C3, C), lambda b, t: (0, 0)),                # qkv_w
            pl.BlockSpec((C3, 1), lambda b, t: (0, 0)),                # qkv_b
            pl.BlockSpec((C3, 9), lambda b, t: (0, 0)),                # dw_w
            pl.BlockSpec((C3, 1), lambda b, t: (0, 0)),                # dw_b
        ],
        out_specs=(
            pl.BlockSpec((None, C, RW), lambda b, t: (b, 0, t)),       # v
            pl.BlockSpec((None, C, C), lambda b, t: (b, 0, 0)),        # attn
        ),
        scratch_shapes=[pltpu.VMEM((C, C), jnp.float32),
                        pltpu.VMEM((C, 1), jnp.float32),
                        pltpu.VMEM((C, 1), jnp.float32)],
        compiler_params=pltpu.CompilerParams(
            dimension_semantics=("parallel", "arbitrary"),
            vmem_limit_bytes=lim_a),
    )(temp_rows, x3, x4, x4, qkv_w, qkv_b, dw_w, dw_b)

    y = pl.pallas_call(
        _attn_out_kernel,
        out_shape=jax.ShapeDtypeStruct((B, C, HW), x.dtype),
        grid=(B, T),
        in_specs=[
            pl.BlockSpec((None, C, C), lambda b, t: (b, 0, 0)),        # attn
            pl.BlockSpec((None, C, RW), lambda b, t: (b, 0, t)),       # v
            pl.BlockSpec((C, C), lambda b, t: (0, 0)),                 # proj_w
            pl.BlockSpec((C, 1), lambda b, t: (0, 0)),                 # proj_b
        ],
        out_specs=pl.BlockSpec((None, C, RW), lambda b, t: (b, 0, t)),
        compiler_params=pltpu.CompilerParams(
            dimension_semantics=("parallel", "parallel"),
            vmem_limit_bytes=lim_b),
    )(attn, v_hbm, proj_w, proj_b)

    return y.reshape(B, C, H, W)


def attention_forward(x, params, num_heads, tile_rows=None):
    B, C, H, W = x.shape
    assert C % num_heads == 0
    cap = _vmem_capacity_bytes()
    budget = int(max(32 << 20, min(cap - (16 << 20), 100 << 20)) * 0.7)
    valid = _valid_tile_rows(H, W)
    if tile_rows is not None and int(tile_rows) in valid:
        R = int(tile_rows)
    else:
        R = _pick_tile_rows(H, W, C, budget)
    return _attention_impl(x, params, num_heads=num_heads, tile_rows=R,
                           roll_sign=_roll_shift_sign(), vmem_cap=cap)


# ----------------------------------------------------------------------------
# Pure-JAX reference (mirrors the PyTorch module) for verification
# ----------------------------------------------------------------------------
def reference_forward(x, params, num_heads):
    B, C, H, W = x.shape
    HW = H * W
    ch = C // num_heads

    qkv = jnp.einsum("bchw,oc->bohw", x, params["qkv_w"]) \
        + params["qkv_b"][None, :, None, None]
    dw_w = params["dw_w"][:, None, :, :]  # (3C, 1, 3, 3)
    qkv = lax.conv_general_dilated(
        qkv, dw_w, window_strides=(1, 1), padding=((1, 1), (1, 1)),
        dimension_numbers=("NCHW", "OIHW", "NCHW"),
        feature_group_count=3 * C)
    qkv = qkv + params["dw_b"][None, :, None, None]

    q, k, v = jnp.split(qkv, 3, axis=1)
    q = q.reshape(B, num_heads, ch, HW)
    k = k.reshape(B, num_heads, ch, HW)
    v = v.reshape(B, num_heads, ch, HW)

    qn = q / jnp.maximum(jnp.linalg.norm(q, axis=-1, keepdims=True), 1e-12)
    kn = k / jnp.maximum(jnp.linalg.norm(k, axis=-1, keepdims=True), 1e-12)

    attn = jnp.einsum("bhcn,bhdn->bhcd", qn, kn) * params["temperature"][None]
    attn = jax.nn.softmax(attn, axis=-1)
    out = jnp.einsum("bhcd,bhdn->bhcn", attn, v).reshape(B, C, H, W)

    out = jnp.einsum("bchw,oc->bohw", out, params["proj_w"]) \
        + params["proj_b"][None, :, None, None]
    return out


# ----------------------------------------------------------------------------
# Deterministic parameter init + test run
# ----------------------------------------------------------------------------
def init_params(key, dim, num_heads):
    ks = jax.random.split(key, 7)
    scale = 0.1
    return {
        "temperature": jnp.ones((num_heads, 1, 1), jnp.float32)
                       + 0.1 * jax.random.normal(ks[0], (num_heads, 1, 1),
                                                 jnp.float32),
        "qkv_w": scale * jax.random.normal(ks[1], (3 * dim, dim), jnp.float32),
        "qkv_b": scale * jax.random.normal(ks[2], (3 * dim,), jnp.float32),
        "dw_w": scale * jax.random.normal(ks[3], (3 * dim, 3, 3), jnp.float32),
        "dw_b": scale * jax.random.normal(ks[4], (3 * dim,), jnp.float32),
        "proj_w": scale * jax.random.normal(ks[5], (dim, dim), jnp.float32),
        "proj_b": scale * jax.random.normal(ks[6], (dim,), jnp.float32),
    }


if __name__ == "__main__":
    B, dim, H, W = 2, 16, 16, 16
    num_heads = 4

    key = jax.random.PRNGKey(0)
    k_x, k_p = jax.random.split(key)
    x = jax.random.normal(k_x, (B, dim, H, W), jnp.float32)
    params = init_params(k_p, dim, num_heads)

    # Auto tile size (whole image at this small shape) and a forced 2-tile run
    # that exercises the halo / accumulation path.
    out = jax.block_until_ready(attention_forward(x, params, num_heads))
    out_tiled = jax.block_until_ready(
        attention_forward(x, params, num_heads, tile_rows=8))
    ref = reference_forward(x, params, num_heads)

    assert out.shape == (B, dim, H, W)
    err = float(jnp.max(jnp.abs(out - ref)))
    err_t = float(jnp.max(jnp.abs(out_tiled - ref)))
    # bf16 MXU inputs (fp32 accumulation) -> ~1e-3-level absolute error.
    assert jnp.allclose(out, ref, atol=1e-2, rtol=1e-2), err
    assert jnp.allclose(out_tiled, ref, atol=1e-2, rtol=1e-2), err_t

    print("KERNEL_OK")
</pallas_src>

<mosaic_0001>
module attributes {stable_mosaic.version = 11 : i64} {
  func.func @probe(%arg0: memref<8x128xi32, #tpu.memory_space<vmem>>, %arg1: memref<8x128xi32, #tpu.memory_space<vmem>>) attributes {dimension_semantics = [], scalar_prefetch = 0 : i64, scratch_operands = 0 : i64, tpu.core_type = #tpu.core_type<tc>} {
    %c0 = arith.constant 0 : index
    %c0_0 = arith.constant 0 : index
    %0 = vector.load %arg0[%c0, %c0_0] : memref<8x128xi32, #tpu.memory_space<vmem>>, vector<8x128xi32>
    %c1_i32 = arith.constant 1 : i32
    %1 = tpu.dynamic_rotate %0 by %c1_i32 dim 1 : vector<8x128xi32>, i32 -> vector<8x128xi32>
    %c0_1 = arith.constant 0 : index
    %c0_2 = arith.constant 0 : index
    %2 = vector.load %arg1[%c0_1, %c0_2] : memref<8x128xi32, #tpu.memory_space<vmem>>, vector<8x128xi32>
    tpu.vector_store %arg1[%c0_1, %c0_2], %1 {strides = array<i32>} : memref<8x128xi32, #tpu.memory_space<vmem>>, vector<8x128xi32>,
    return
  }
}

</mosaic_0001>

<bundles_post_ra>
// kernel: tpu_custom_call.1
= control target key start
LH: loop header
LB: loop body
LE: loop exit
PB: predicated region body
PF: predicated region fallthrough
CT: control target
= control target key end

     0   :  { %6 = vsyncpa [#allocation3], 0  ;;  %s128_s0 = inlined_call_operand.hbm [shape: s32[8,128], index: 0, kind: input, shape index: {}]   ;;  %s129_s1 = inlined_call_operand.hbm [shape: s32[8,128], index: 1, kind: output, shape index: {}]  }
   0x1   :  { %7 = vsyncpa [#allocation4], 0  ;;  %s91_s6 = smov [#allocation2]   ;;  %s43_s10 = scalar_lea.hbm %s128_s0, 128 }
   0x2   :  { %s14_s7 = sshll.u32 %s91_s6, 4  ;;  %p44_p0 = scmp.ne.s32.totalorder %s128_s0, %s43_s10  ;;  %s15_s7 = int_to_ptr.vmem [resolvable:$true] %s14_s7 }
   0x3   :  { %p47_p1 = scmp.lt.u32.totalorder %s43_s10, %s128_s0 }
   0x5   :  { %p49_p2 = pnand %p47_p1, %p44_p0 }
   0x7   :  { %52 = shalt.err (!%p49_p2)
}
   0x8   :  { %s53_s15 = scalar_lea.vmem %s15_s7, 128  ;;  %p58_p4 = scmp.lt.s32.totalorder %s15_s7, %s15_s7 }
   0x9   :  { %p54_p3 = scmp.ne.s32.totalorder %s15_s7, %s53_s15  ;;  %p59_p5 = scmp.lt.s32.totalorder %s53_s15, %s53_s15 }
   0xb   :  { %p60_p6 = por %p59_p5, %p58_p4 }
   0xd   :  { %p61_p7 = pnand %p60_p6, %p54_p3 }
   0xf   :  { %64 = shalt.err (!%p61_p7)
}
  0x10   :  { %17 = dma.hbm_to_vmem [thread:$0]  %s128_s0, 128, %s15_s7, [#allocation3]  }
  0x11   :  { %87 = dma.done.wait [#allocation3], 128  }
  0x12   :  { %88 = vsyncadd [#allocation3], 4294967168  ;;  %v21_v0 = vld [vmem:[#allocation2] sm:$0xff]  ;;  %s92_s18 = smov 1   ;;  %s93_s19 = smov [#allocation5]  }
  0x13   :  { %22 = vrot.lane.b32.xlu0 %v21_v0, %s92_s18  ;;  %s31_s20 = sshll.u32 %s93_s19, 4  ;;  %s32_s20 = int_to_ptr.vmem [resolvable:$true] %s31_s20 }
  0x14   :  { %s65_s21 = scalar_lea.vmem %s32_s20, 128  ;;  %p70_p9 = scmp.lt.s32.totalorder %s32_s20, %s32_s20 }
  0x15   :  { %p66_p8 = scmp.ne.s32.totalorder %s32_s20, %s65_s21  ;;  %p71_p10 = scmp.lt.s32.totalorder %s65_s21, %s65_s21 }
  0x17   :  { %p72_p11 = por %p71_p10, %p70_p9 }
  0x19   :  { %p73_p12 = pnand %p72_p11, %p66_p8 }
  0x85   :  { %v23_v1 = vpop.permute.xlu0 %22 }
  0x86   :  { %24 = vst [vmem:[#allocation5] sm:$0xff] %v23_v1 }
  0x87   :  { %76 = shalt.err (!%p73_p12)
}
  0x88   :  { %s77_s0 = scalar_lea.hbm %s129_s1, 128 }
  0x89   :  { %p78_p13 = scmp.ne.s32.totalorder %s129_s1, %s77_s0  ;;  %p81_p0 = scmp.lt.u32.totalorder %s77_s0, %s129_s1 }
  0x8b   :  { %p83_p1 = pnand %p81_p0, %p78_p13 }
  0x8d   :  { %86 = shalt.err (!%p83_p1)
}
  0x8e   :  { %34 = dma.vmem_to_hbm [thread:$0]  %s32_s20, 128, %s129_s1, [#allocation4]  }
  0x8f   :  { %89 = dma.done.wait [#allocation4], 128  }
  0x90   :  { %90 = vsyncadd [#allocation4], 4294967168 }
  0x91   :  { %38 = vsyncpa [#allocation3], 1 }
  0x92   :  { %39 = vsyncpa [#allocation4], 1 }

</bundles_post_ra>
